<compile_context>
chip_gen: v7x
topology: tpu7x:2x2x1
jax: 0.10.0
libtpu: 0.0.40
codegen_flags: <defaults>
</compile_context>

<pallas_src>
import jax
import jax.numpy as jnp
from jax.experimental import pallas as pl
from jax.experimental.pallas import tpu as pltpu


_MAX_BLOCK_BYTES = 4 * 1024 * 1024   # target bytes per input block (x2 inputs x2 bufs)
_MAX_S_TILE = 2048                   # spatial (lane) tile cap, multiple of 128
_MAX_C_TILE_2D = 1024                # channel (lane) tile cap for the 2D path


def _round_up(x, m):
    return ((x + m - 1) // m) * m


def _cdiv(a, b):
    return -(-a // b)


def _balanced_tile(dim, align, max_tile):
    """Tile size (multiple of `align`, <= max_tile) that minimizes padding."""
    dim_al = _round_up(max(dim, 1), align)
    max_tile = max(align, (max_tile // align) * align)
    n = _cdiv(dim_al, max_tile)
    tile = _round_up(_cdiv(dim_al, n), align)
    return tile, n * tile, n


def _vmem_limit(*buffer_bytes):
    # Each pipelined buffer is double-buffered by Pallas; add margin for the
    # accumulator scratch / semaphores.  Cap below v7x's 64 MiB physical VMEM.
    total = sum(2 * b for b in buffer_bytes) + (4 << 20)
    return int(min(max(total, 24 << 20), 48 << 20))


# --------------------------------------------------------------------------
# Kernels
# --------------------------------------------------------------------------
def _fm_partial_kernel_3d(real_ref, fake_ref, out_ref, acc_ref):
    """Per-channel sum of (real - fake) over batch + spatial axes.

    real/fake block: (B, C_TILE, S_TILE)
    acc scratch    : (B, C_TILE) f32, C on the lane axis
    out block      : (1, 1, C_TILE), written on the last spatial step only
    """
    si = pl.program_id(1)

    @pl.when(si == 0)
    def _init():
        acc_ref[...] = jnp.zeros_like(acc_ref)

    d = real_ref[...].astype(jnp.float32) - fake_ref[...].astype(jnp.float32)
    acc_ref[...] += jnp.sum(d, axis=2)          # lane-axis (spatial) reduce

    @pl.when(si == pl.num_programs(1) - 1)
    def _finalize():
        out_ref[...] = jnp.sum(acc_ref[...], axis=0).reshape(out_ref.shape)


def _fm_partial_kernel_2d(real_ref, fake_ref, out_ref):
    """Per-channel sum of (real - fake) over the batch axis (C on lanes)."""
    d = real_ref[...].astype(jnp.float32) - fake_ref[...].astype(jnp.float32)
    out_ref[...] = jnp.sum(d, axis=0).reshape(out_ref.shape)


# --------------------------------------------------------------------------
# Wrappers
# --------------------------------------------------------------------------
def _fm_loss_4d(features_real, features_fake):
    b, c, h, w = features_real.shape
    s = h * w
    r = features_real.reshape(b, c, s)
    f = features_fake.reshape(b, c, s)
    itemsize = jnp.dtype(r.dtype).itemsize

    s_tile, s_pad, n_s = _balanced_tile(s, 128, _MAX_S_TILE)
    max_c_tile = max(8, _MAX_BLOCK_BYTES // max(1, b * s_tile * itemsize))
    c_tile, c_pad, n_c = _balanced_tile(c, 8, max_c_tile)

    if (c_pad, s_pad) != (c, s):
        pad = ((0, 0), (0, c_pad - c), (0, s_pad - s))
        r = jnp.pad(r, pad)        # zero padding: contributes 0 to the sums
        f = jnp.pad(f, pad)

    block_bytes = b * c_tile * s_tile * itemsize

    partials = pl.pallas_call(
        _fm_partial_kernel_3d,
        out_shape=jax.ShapeDtypeStruct((n_c, 1, c_tile), jnp.float32),
        grid_spec=pltpu.PrefetchScalarGridSpec(
            num_scalar_prefetch=0,
            grid=(n_c, n_s),                       # reduction (spatial) axis last
            in_specs=[
                pl.BlockSpec((b, c_tile, s_tile), lambda ci, si: (0, ci, si)),
                pl.BlockSpec((b, c_tile, s_tile), lambda ci, si: (0, ci, si)),
            ],
            out_specs=pl.BlockSpec((1, 1, c_tile), lambda ci, si: (ci, 0, 0)),
            scratch_shapes=[pltpu.VMEM((b, c_tile), jnp.float32)],
        ),
        compiler_params=pltpu.CompilerParams(
            dimension_semantics=("parallel", "arbitrary"),
            vmem_limit_bytes=_vmem_limit(block_bytes, block_bytes, c_tile * 4),
        ),
    )(r, f)

    per_channel = partials.reshape(n_c * c_tile)[:c] / jnp.float32(b * s)
    return jnp.mean(jnp.abs(per_channel))


def _fm_loss_2d(features_real, features_fake):
    b, c = features_real.shape
    itemsize = jnp.dtype(features_real.dtype).itemsize

    max_c_tile = max(128, _MAX_BLOCK_BYTES // max(1, b * itemsize))
    c_tile, c_pad, n_c = _balanced_tile(c, 128, min(_MAX_C_TILE_2D, max_c_tile))

    r, f = features_real, features_fake
    if c_pad != c:
        pad = ((0, 0), (0, c_pad - c))
        r = jnp.pad(r, pad)
        f = jnp.pad(f, pad)

    block_bytes = b * c_tile * itemsize

    partials = pl.pallas_call(
        _fm_partial_kernel_2d,
        out_shape=jax.ShapeDtypeStruct((n_c, 1, c_tile), jnp.float32),
        grid_spec=pltpu.PrefetchScalarGridSpec(
            num_scalar_prefetch=0,
            grid=(n_c,),
            in_specs=[
                pl.BlockSpec((b, c_tile), lambda ci: (0, ci)),
                pl.BlockSpec((b, c_tile), lambda ci: (0, ci)),
            ],
            out_specs=pl.BlockSpec((1, 1, c_tile), lambda ci: (ci, 0, 0)),
        ),
        compiler_params=pltpu.CompilerParams(
            dimension_semantics=("parallel",),
            vmem_limit_bytes=_vmem_limit(block_bytes, block_bytes, c_tile * 4),
        ),
    )(r, f)

    per_channel = partials.reshape(n_c * c_tile)[:c] / jnp.float32(b)
    return jnp.mean(jnp.abs(per_channel))


def feature_matching_loss(features_real, features_fake):
    real_shape = tuple(features_real.shape)
    fake_shape = tuple(features_fake.shape)
    if real_shape != fake_shape:
        raise RuntimeError(
            "Dimension mismatch: {} and {}".format(real_shape, fake_shape))
    if len(real_shape) not in (2, 4):
        raise RuntimeError(
            "Invalid number of dimensions. Expected one of [2, 4], got {} "
            "instead.".format(len(real_shape)))
    if len(real_shape) == 4:
        return _fm_loss_4d(features_real, features_fake)
    return _fm_loss_2d(features_real, features_fake)


# --------------------------------------------------------------------------
# Reference + self-test
# --------------------------------------------------------------------------
def _reference_loss(features_real, features_fake):
    if features_real.ndim == 4:
        fr = jnp.mean(features_real.astype(jnp.float32), axis=(2, 3))
        ff = jnp.mean(features_fake.astype(jnp.float32), axis=(2, 3))
    else:
        fr = features_real.astype(jnp.float32)
        ff = features_fake.astype(jnp.float32)
    fr = jnp.mean(fr, axis=0)
    ff = jnp.mean(ff, axis=0)
    return jnp.mean(jnp.abs(fr - ff))


def _check(real, fake, atol):
    loss = feature_matching_loss(real, fake)
    jax.block_until_ready(loss)
    ref = _reference_loss(real, fake)
    assert jnp.allclose(loss, ref, atol=atol, rtol=1e-4), (loss, ref, real.shape)


if __name__ == "__main__":
    key = jax.random.PRNGKey(0)
    ks = jax.random.split(key, 10)

    # 4D, single-tile grid: (B, C, H, W) = (2, 4, 16, 16)
    _check(jax.random.normal(ks[0], (2, 4, 16, 16), dtype=jnp.float32),
           jax.random.normal(ks[1], (2, 4, 16, 16), dtype=jnp.float32), atol=1e-5)

    # 4D, multi-step spatial reduction + channel padding: S = 48*48 = 2304 > S_TILE
    _check(jax.random.normal(ks[2], (2, 20, 48, 48), dtype=jnp.float32),
           jax.random.normal(ks[3], (2, 20, 48, 48), dtype=jnp.float32), atol=1e-5)

    # 4D, bf16 inputs streamed as bf16 (f32 accumulation in-kernel)
    _check(jax.random.normal(ks[4], (2, 8, 16, 16), dtype=jnp.bfloat16),
           jax.random.normal(ks[5], (2, 8, 16, 16), dtype=jnp.bfloat16), atol=1e-4)

    # 2D, single tile: (B, C) = (2, 32), C on the lane axis
    _check(jax.random.normal(ks[6], (2, 32), dtype=jnp.float32),
           jax.random.normal(ks[7], (2, 32), dtype=jnp.float32), atol=1e-5)

    # 2D, multiple channel tiles + padding: (B, C) = (2, 1500)
    _check(jax.random.normal(ks[8], (2, 1500), dtype=jnp.float32),
           jax.random.normal(ks[9], (2, 1500), dtype=jnp.float32), atol=1e-5)

    print("KERNEL_OK")
</pallas_src>

<mosaic_0001>
module attributes {stable_mosaic.version = 11 : i64} {
  func.func @_fm_partial_kernel_3d(%arg0: i32, %arg1: i32, %arg2: memref<2x8x256xf32, #tpu.memory_space<vmem>>, %arg3: memref<2x8x256xf32, #tpu.memory_space<vmem>>, %arg4: memref<1x1x8xf32, #tpu.memory_space<vmem>>, %arg5: memref<2x8xf32, #tpu.memory_space<vmem>>) attributes {dimension_semantics = [#tpu.dimension_semantics<parallel>, #tpu.dimension_semantics<arbitrary>], iteration_bounds = array<i64: 1, 1>, scalar_prefetch = 0 : i64, scratch_operands = 1 : i64, tpu.core_type = #tpu.core_type<tc>, window_params = [{transform_indices = @transform_0, window_bounds = array<i64: 2, 8, 256>}, {transform_indices = @transform_1, window_bounds = array<i64: 2, 8, 256>}, {transform_indices = @transform_2, window_bounds = array<i64: 1, 1, 8>}]} {
    %c0_i32 = arith.constant 0 : i32
    %0 = arith.cmpi eq, %arg1, %c0_i32 : i32
    %1 = arith.extui %0 : i1 to i32
    %c0_i32_0 = arith.constant 0 : i32
    %2 = arith.cmpi ne, %1, %c0_i32_0 : i32
    scf.if %2 {
      %cst_12 = arith.constant 0.000000e+00 : f32
      %13 = vector.broadcast %cst_12 : f32 to vector<2x8xf32>
      %c0_13 = arith.constant 0 : index
      %c0_14 = arith.constant 0 : index
      %14 = vector.load %arg5[%c0_13, %c0_14] : memref<2x8xf32, #tpu.memory_space<vmem>>, vector<2x8xf32>
      tpu.vector_store %arg5[%c0_13, %c0_14], %13 {strides = array<i32>} : memref<2x8xf32, #tpu.memory_space<vmem>>, vector<2x8xf32>,
    } else {
    }
    %c0 = arith.constant 0 : index
    %c0_1 = arith.constant 0 : index
    %c0_2 = arith.constant 0 : index
    %3 = vector.load %arg2[%c0, %c0_1, %c0_2] : memref<2x8x256xf32, #tpu.memory_space<vmem>>, vector<2x8x256xf32>
    %c0_3 = arith.constant 0 : index
    %c0_4 = arith.constant 0 : index
    %c0_5 = arith.constant 0 : index
    %4 = vector.load %arg3[%c0_3, %c0_4, %c0_5] : memref<2x8x256xf32, #tpu.memory_space<vmem>>, vector<2x8x256xf32>
    %5 = arith.subf %3, %4 : vector<2x8x256xf32>
    %c0_6 = arith.constant 0 : index
    %c0_7 = arith.constant 0 : index
    %6 = vector.load %arg5[%c0_6, %c0_7] : memref<2x8xf32, #tpu.memory_space<vmem>>, vector<2x8xf32>
    %cst = arith.constant dense<0.000000e+00> : vector<2x8xf32>
    %7 = vector.multi_reduction <add>, %5, %cst [2] : vector<2x8x256xf32> to vector<2x8xf32>
    %8 = arith.addf %6, %7 : vector<2x8xf32>
    %c0_8 = arith.constant 0 : index
    %c0_9 = arith.constant 0 : index
    %9 = vector.load %arg5[%c0_8, %c0_9] : memref<2x8xf32, #tpu.memory_space<vmem>>, vector<2x8xf32>
    tpu.vector_store %arg5[%c0_8, %c0_9], %8 {strides = array<i32>} : memref<2x8xf32, #tpu.memory_space<vmem>>, vector<2x8xf32>,
    %c0_i32_10 = arith.constant 0 : i32
    %10 = arith.cmpi eq, %arg1, %c0_i32_10 : i32
    %11 = arith.extui %10 : i1 to i32
    %c0_i32_11 = arith.constant 0 : i32
    %12 = arith.cmpi ne, %11, %c0_i32_11 : i32
    scf.if %12 {
      %c0_12 = arith.constant 0 : index
      %c0_13 = arith.constant 0 : index
      %13 = vector.load %arg5[%c0_12, %c0_13] : memref<2x8xf32, #tpu.memory_space<vmem>>, vector<2x8xf32>
      %cst_14 = arith.constant dense<0.000000e+00> : vector<8xf32>
      %14 = vector.multi_reduction <add>, %13, %cst_14 [0] : vector<2x8xf32> to vector<8xf32>
      %15 = vector.shape_cast %14 : vector<8xf32> to vector<1x1x8xf32>
      %c0_15 = arith.constant 0 : index
      %c0_16 = arith.constant 0 : index
      %c0_17 = arith.constant 0 : index
      %16 = vector.load %arg4[%c0_15, %c0_16, %c0_17] : memref<1x1x8xf32, #tpu.memory_space<vmem>>, vector<1x1x8xf32>
      tpu.vector_store %arg4[%c0_15, %c0_16, %c0_17], %15 {strides = array<i32>} : memref<1x1x8xf32, #tpu.memory_space<vmem>>, vector<1x1x8xf32>,
    } else {
    }
    return
  }
  func.func @transform_0(%arg0: i32, %arg1: i32) -> (i32, i32, i32) {
    %c0_i32 = arith.constant 0 : i32
    %c0_i32_0 = arith.constant 0 : i32
    return %c0_i32, %arg0, %arg1 : i32, i32, i32
  }
  func.func @transform_1(%arg0: i32, %arg1: i32) -> (i32, i32, i32) {
    %c0_i32 = arith.constant 0 : i32
    %c0_i32_0 = arith.constant 0 : i32
    return %c0_i32, %arg0, %arg1 : i32, i32, i32
  }
  func.func @transform_2(%arg0: i32, %arg1: i32) -> (i32, i32, i32) {
    %c0_i32 = arith.constant 0 : i32
    %c0_i32_0 = arith.constant 0 : i32
    %c0_i32_1 = arith.constant 0 : i32
    return %arg0, %c0_i32, %c0_i32_0 : i32, i32, i32
  }
}

</mosaic_0001>

<bundles_post_ra>
// kernel: tpu_custom_call.1
= control target key start
LH: loop header
LB: loop body
LE: loop exit
PB: predicated region body
PF: predicated region fallthrough
CT: control target
= control target key end

     0   :  { %7 = vsyncpa [#allocation4], 0  ;;  %s250_s0 = inlined_call_operand.hbm [shape: f32[2,8,256], index: 0, kind: input, shape index: {}]   ;;  %s251_s1 = inlined_call_operand.hbm [shape: f32[2,8,256], index: 1, kind: input, shape index: {}]   ;;  %s252_s2 = inlined_call_operand.hbm [shape: f32[1,1,8], index: 2, kind: output, shape index: {}]  }
   0x1   :  { %8 = vsyncpa [#allocation7], 0 }
   0x2   :  { %9 = vsyncpa [#allocation5], 0  ;;  %s190_s9 = smov [#allocation3]   ;;  %s118_s13 = scalar_lea.hbm %s250_s0, 512 }
   0x3   :  { %s15_s10 = sshll.u32 %s190_s9, 4  ;;  %p119_p0 = scmp.ne.s32.totalorder %s250_s0, %s118_s13  ;;  %s16_s10 = int_to_ptr.vmem [resolvable:$true] %s15_s10 }
   0x4   :  { %p122_p1 = scmp.lt.u32.totalorder %s118_s13, %s250_s0 }
   0x6   :  { %p124_p2 = pnand %p122_p1, %p119_p0 }
   0x8   :  { %127 = shalt.err (!%p124_p2)
}
   0x9   :  { %s128_s18 = scalar_lea.vmem %s16_s10, 512  ;;  %p133_p4 = scmp.lt.s32.totalorder %s16_s10, %s16_s10 }
   0xa   :  { %p129_p3 = scmp.ne.s32.totalorder %s16_s10, %s128_s18  ;;  %p134_p5 = scmp.lt.s32.totalorder %s128_s18, %s128_s18 }
   0xc   :  { %p135_p6 = por %p134_p5, %p133_p4 }
   0xe   :  { %p136_p7 = pnand %p135_p6, %p129_p3 }
  0x10   :  { %139 = shalt.err (!%p136_p7)
}
  0x11   :  { %s191_s19 = smov 256   ;;  %s192_s20 = smov 16  }
  0x12   :  { %21 = dma.hbm_to_vmem [thread:$0]  %s250_s0, 512, %s16_s10, [#allocation4], %s191_s19, %s191_s19, %s192_s20  }
  0x13   :  { %s193_s23 = smov [#allocation6]   ;;  %s140_s27 = scalar_lea.hbm %s251_s1, 512 }
  0x14   :  { %s27_s24 = sshll.u32 %s193_s23, 4  ;;  %p141_p8 = scmp.ne.s32.totalorder %s251_s1, %s140_s27  ;;  %s28_s24 = int_to_ptr.vmem [resolvable:$true] %s27_s24 }
  0x15   :  { %p144_p9 = scmp.lt.u32.totalorder %s140_s27, %s251_s1 }
  0x17   :  { %p146_p10 = pnand %p144_p9, %p141_p8 }
  0x19   :  { %149 = shalt.err (!%p146_p10)
}
  0x1a   :  { %s150_s4 = scalar_lea.vmem %s28_s24, 512  ;;  %p155_p12 = scmp.lt.s32.totalorder %s28_s24, %s28_s24 }
  0x1b   :  { %p151_p11 = scmp.ne.s32.totalorder %s28_s24, %s150_s4  ;;  %p156_p13 = scmp.lt.s32.totalorder %s150_s4, %s150_s4 }
  0x1d   :  { %p157_p0 = por %p156_p13, %p155_p12 }
  0x1f   :  { %p158_p1 = pnand %p157_p0, %p151_p11 }
  0x21   :  { %161 = shalt.err (!%p158_p1)
}
  0x22   :  { %33 = dma.hbm_to_vmem [thread:$0]  %s251_s1, 512, %s28_s24, [#allocation7], %s191_s19, %s191_s19, %s192_s20  }
  0x23   :  { %184 = dma.done.wait [#allocation4], 512  }
  0x24   :  { %185 = vsyncadd [#allocation4], 4294966784 }
  0x25   :  { %186 = dma.done.wait [#allocation7], 512  }
  0x26   :  { %187 = vsyncadd [#allocation7], 4294966784  ;;  %v46_v0 = vld [vmem:[#allocation3] sm:$0xff]  ;;  %v47_v1 = vld [vmem:[#allocation3 + $0x8] sm:$0xff]  ;;  %vm44_vm0 = vcmask 58368   ;;  %v194_v14 = vmov 0.0   ;;  %v67_v15 = vlaneseq }
  0x27   :  { %v50_v2 = vld [vmem:[#allocation6] sm:$0xff]  ;;  %v51_v3 = vld [vmem:[#allocation6 + $0x8] sm:$0xff]  ;;  %v48_v5 = vld [vmem:[#allocation3 + $0x10] sm:$0xff]  ;;  %45 = vst.msk [vmem:[#allocation2] sm:$0x3] %vm44_vm0, %v194_v14  ;;  %vm77_vm1 = vcmask 1041409  }
  0x28   :  { %v54_v4 = vsub.f32 %v46_v0, %v50_v2  ;;  %v49_v6 = vld [vmem:[#allocation3 + $0x18] sm:$0xff]  ;;  %v55_v7 = vsub.f32 %v47_v1, %v51_v3  ;;  %v52_v8 = vld [vmem:[#allocation6 + $0x10] sm:$0xff]  ;;  %v68_v16 = vand.u32 127, %v67_v15  ;;  %v70_v17 = vshrl.u32 %v67_v15, 7  ;;  %s195_s1 = smov [#allocation8]  }
  0x29   :  { %v53_v9 = vld [vmem:[#allocation6 + $0x18] sm:$0xff]  ;;  %v56_v10 = vsub.f32 %v48_v5, %v52_v8  ;;  %s102_s6 = sshll.u32 %s195_s1, 4  ;;  %vm94_vm2 = vcmask 57344   ;;  %s103_s6 = int_to_ptr.vmem [resolvable:$true] %s102_s6 }
  0x2a   :  { %v57_v11 = vsub.f32 %v49_v6, %v53_v9  ;;  %v59_v12 = vadd.f32 %v55_v7, %v54_v4  ;;  %v71_v19 = vsub.s32 %v68_v16, %v70_v17  ;;  %s162_s7 = scalar_lea.vmem %s103_s6, 16  ;;  %s166_s8 = scalar_lea.vmem %s103_s6, 32 }
  0x2b   :  { %p163_p2 = scmp.ne.s32.totalorder %s103_s6, %s162_s7  ;;  %p167_p3 = scmp.lt.s32.totalorder %s103_s6, %s103_s6 }
  0x2c   :  { %60 = vadd.xlane.f32.xlu0 %v59_v12  ;;  %v62_v13 = vadd.f32 %v57_v11, %v56_v10  ;;  %p168_p4 = scmp.lt.s32.totalorder %s166_s8, %s162_s7 }
  0x2e   :  { %v58_v22 = vld [vmem:[#allocation2] sm:$0x3]  ;;  %p169_p5 = por %p168_p4, %p167_p3 }
  0x30   :  { %63 = vadd.xlane.f32.xlu0 %v62_v13  ;;  %p170_p6 = pnand %p169_p5, %p163_p2 }
  0xb9   :  { %v61_v18 = vpop.xlane.xlu0 %60 }
  0xba   :  { %v72_v21 = vrot.slane %v61_v18, %v71_v19 }
  0xbd   :  { %v64_v20 = vpop.xlane.xlu0 %63 }
  0xbe   :  { %v76_v23 = vrot.slane %v64_v20, %v71_v19 }
  0xc0   :  { %v78_v24 = vsel %vm77_vm1, %v76_v23, %v72_v21 }
  0xc1   :  { %v80_v25 = vadd.f32 %v78_v24, %v58_v22 }
  0xc3   :  { %82 = vst.msk [vmem:[#allocation2] sm:$0x3] %vm44_vm0, %v80_v25 }
  0xca   :  { %v86_v26 = vld [vmem:[#allocation2] sm:$0x3] }
  0xcb   :  { %v87_v27 = vsel %vm44_vm0, %v86_v26, 0.0 }
  0xcc   :  { %v88_v28 = vrot.slane %v87_v27, 4 }
  0xce   :  { %v89_v29 = vadd.f32 %v88_v28, %v87_v27 }
  0xd0   :  { %v90_v30 = vrot.slane %v89_v29, 2 }
  0xd2   :  { %v91_v31 = vadd.f32 %v90_v30, %v89_v29 }
  0xd4   :  { %v92_v32 = vrot.slane %v91_v31, 1 }
  0xd6   :  { %v93_v33 = vadd.f32 %v92_v32, %v91_v31 }
  0xd8   :  { %95 = vst.msk [vmem:[#allocation8] sm:$0x1] %vm94_vm2, %v93_v33 }
  0xd9   :  { %173 = shalt.err (!%p170_p6)
}
  0xda   :  { %s174_s11 = scalar_lea.hbm %s252_s2, 16 }
  0xdb   :  { %p175_p7 = scmp.ne.s32.totalorder %s252_s2, %s174_s11  ;;  %p178_p8 = scmp.lt.u32.totalorder %s174_s11, %s252_s2 }
  0xdd   :  { %p180_p9 = pnand %p178_p8, %p175_p7 }
  0xdf   :  { %183 = shalt.err (!%p180_p9)
}
  0xe0   :  { %105 = dma.vmem_to_hbm [thread:$0]  %s103_s6, 16, %s252_s2, [#allocation5]  }
  0xe1   :  { %188 = dma.done.wait [#allocation5], 16  }
  0xe2   :  { %189 = vsyncadd [#allocation5], 4294967280 }
  0xe3   :  { %109 = vsyncpa [#allocation4], 1 }
  0xe4   :  { %110 = vsyncpa [#allocation7], 1 }
  0xe5   :  { %111 = vsyncpa [#allocation5], 1 }

</bundles_post_ra>
